<compile_context>
chip_gen: v5e
topology: v5e:2x2
jax: 0.10.0
libtpu: 0.0.40
codegen_flags: <defaults>
</compile_context>

<pallas_src>
import jax
import jax.numpy as jnp
from jax.experimental import pallas as pl
from jax.experimental.pallas import tpu as pltpu

IMAGE_DIM = 256
TEXT_DIM = 128
MAP_DIM = 128
PROJ_DIM = 128
NUM_LAYERS = 2          # the 2 MLP layers are hard-coded below
OUT_DIM = 1             # 'FB' dataset -> binary head
EPS = 1e-12             # torch.nn.functional.normalize default eps

# --- packed parameter layout -------------------------------------------------
# weight blob (bf16), shape (W_ROWS, 128), pre-transposed (in, out):
#   [0:256)    wi   img_proj   (IMAGE_DIM, MAP_DIM)
#   [256:384)  wt   text_proj  (TEXT_DIM,  MAP_DIM)
#   [384:512)  w1   mlp[1]     (MAP_DIM,   PROJ_DIM)
#   [512:640)  w2   mlp[4]     (PROJ_DIM,  PROJ_DIM)
W_ROWS = IMAGE_DIM + TEXT_DIM + MAP_DIM + PROJ_DIM       # 640
OFF_WI, OFF_WT = 0, IMAGE_DIM
OFF_W1 = IMAGE_DIM + TEXT_DIM
OFF_W2 = OFF_W1 + MAP_DIM
# small f32 blob, shape (8, 128):
#   row 0 bi, row 1 bt, row 2 b1, row 3 b2,
#   row 4 wo (output weight as a (1,128) row), row 5 bo broadcast, rows 6-7 pad
S_ROWS = 8


def _classifier_kernel(img_ref, txt_ref, w_ref, s_ref, out_ref):
    bi = s_ref[0:1, :]
    bt = s_ref[1:2, :]
    b1 = s_ref[2:3, :]
    b2 = s_ref[3:4, :]
    wo = s_ref[4:5, :]
    bo = s_ref[5:6, :]

    # img_proj / text_proj : Linear (+ Dropout == identity in eval)
    img = jnp.dot(img_ref[...].astype(jnp.bfloat16),
                  w_ref[OFF_WI:OFF_WI + IMAGE_DIM, :],
                  preferred_element_type=jnp.float32) + bi
    txt = jnp.dot(txt_ref[...].astype(jnp.bfloat16),
                  w_ref[OFF_WT:OFF_WT + TEXT_DIM, :],
                  preferred_element_type=jnp.float32) + bt

    # F.normalize(p=2, dim=1): x / max(||x||, eps)  ==  x * rsqrt(max(||x||^2, eps^2))
    img_inv = jax.lax.rsqrt(
        jnp.maximum(jnp.sum(img * img, axis=1, keepdims=True), EPS * EPS))
    txt_inv = jax.lax.rsqrt(
        jnp.maximum(jnp.sum(txt * txt, axis=1, keepdims=True), EPS * EPS))

    # fusion_mode == 'align': elementwise product
    x = (img * img_inv) * (txt * txt_inv)

    # MLP: 2 x (Linear -> ReLU); Dropout layers identity in eval
    h = jnp.maximum(
        jnp.dot(x.astype(jnp.bfloat16), w_ref[OFF_W1:OFF_W1 + MAP_DIM, :],
                preferred_element_type=jnp.float32) + b1, 0.0)
    h = jnp.maximum(
        jnp.dot(h.astype(jnp.bfloat16), w_ref[OFF_W2:OFF_W2 + PROJ_DIM, :],
                preferred_element_type=jnp.float32) + b2, 0.0)

    # output_layer: Linear(proj_dim, 1) as VPU multiply + XLU lane reduction.
    logit = jnp.sum(h * wo, axis=1, keepdims=True)        # (TB, 1)
    # lane-dense store: every lane holds logit + bo; wrapper keeps column 0.
    out_ref[...] = logit + bo                              # (TB, 128)


def _round_up(x, m):
    return (x + m - 1) // m * m


def classifier_forward(img_feats, text_feats, packed, *, block_b=128):
    """packed = (w_blob bf16 (640,128), s_blob f32 (8,128)) from pack_params()."""
    w_blob, s_blob = packed
    B = img_feats.shape[0]
    tb = min(block_b, _round_up(B, 8))
    Bp = _round_up(B, tb)
    if Bp != B:
        pad = Bp - B
        img_feats = jnp.pad(img_feats, ((0, pad), (0, 0)))
        text_feats = jnp.pad(text_feats, ((0, pad), (0, 0)))

    out = pl.pallas_call(
        _classifier_kernel,
        out_shape=jax.ShapeDtypeStruct((Bp, MAP_DIM), jnp.float32),
        grid=(Bp // tb,),
        in_specs=[
            pl.BlockSpec((tb, IMAGE_DIM), lambda i: (i, 0)),
            pl.BlockSpec((tb, TEXT_DIM), lambda i: (i, 0)),
            # weights resident across all batch tiles (same block every step)
            pl.BlockSpec((W_ROWS, MAP_DIM), lambda i: (0, 0)),
            pl.BlockSpec((S_ROWS, MAP_DIM), lambda i: (0, 0)),
        ],
        out_specs=pl.BlockSpec((tb, MAP_DIM), lambda i: (i, 0)),
        compiler_params=pltpu.CompilerParams(
            dimension_semantics=("parallel",)),
    )(img_feats, text_feats, w_blob, s_blob)
    return out[:B, :OUT_DIM]


# --- parameter construction ---------------------------------------------------
def _linear_init(key, fan_in, fan_out):
    """PyTorch nn.Linear default init: U(-1/sqrt(fan_in), +1/sqrt(fan_in)).
    Weight returned pre-transposed as (fan_in, fan_out); bias as (1, fan_out)."""
    kw, kb = jax.random.split(key)
    bound = 1.0 / jnp.sqrt(fan_in)
    w = jax.random.uniform(kw, (fan_in, fan_out), jnp.float32, -bound, bound)
    b = jax.random.uniform(kb, (1, fan_out), jnp.float32, -bound, bound)
    return w, b


def init_params(key):
    k = jax.random.split(key, 5)
    wi, bi = _linear_init(k[0], IMAGE_DIM, MAP_DIM)   # img_proj Linear
    wt, bt = _linear_init(k[1], TEXT_DIM, MAP_DIM)    # text_proj Linear
    w1, b1 = _linear_init(k[2], MAP_DIM, PROJ_DIM)    # mlp layer 1 ('align')
    w2, b2 = _linear_init(k[3], PROJ_DIM, PROJ_DIM)   # mlp layer 2
    wo, bo = _linear_init(k[4], PROJ_DIM, OUT_DIM)    # output layer
    return dict(wi=wi, bi=bi, wt=wt, bt=bt,
                w1=w1, b1=b1, w2=w2, b2=b2, wo=wo, bo=bo)


def pack_params(p):
    """Pack 10 arrays into one bf16 weight blob + one f32 small blob."""
    w_blob = jnp.concatenate([p["wi"], p["wt"], p["w1"], p["w2"]],
                             axis=0).astype(jnp.bfloat16)        # (640, 128)
    bo_row = jnp.broadcast_to(p["bo"].reshape(1, 1), (1, MAP_DIM))
    s_blob = jnp.concatenate([
        p["bi"], p["bt"], p["b1"], p["b2"],
        p["wo"].reshape(1, PROJ_DIM),       # output weight as a row
        bo_row,                             # output bias broadcast on lanes
        jnp.zeros((2, MAP_DIM), jnp.float32),
    ], axis=0).astype(jnp.float32)                                # (8, 128)
    return w_blob, s_blob


# --- pure-JAX reference (mirrors the PyTorch forward, eval, bf16 matmuls) -----
def reference_forward(img_feats, text_feats, p):
    def mm(x, w):
        return jnp.dot(x.astype(jnp.bfloat16), w.astype(jnp.bfloat16),
                       preferred_element_type=jnp.float32)
    img = mm(img_feats, p["wi"]) + p["bi"]
    txt = mm(text_feats, p["wt"]) + p["bt"]
    img = img * jax.lax.rsqrt(
        jnp.maximum(jnp.sum(img * img, axis=1, keepdims=True), EPS * EPS))
    txt = txt * jax.lax.rsqrt(
        jnp.maximum(jnp.sum(txt * txt, axis=1, keepdims=True), EPS * EPS))
    x = img * txt
    h = jax.nn.relu(mm(x, p["w1"]) + p["b1"])
    h = jax.nn.relu(mm(h, p["w2"]) + p["b2"])
    return jnp.sum(h * p["wo"].reshape(1, PROJ_DIM), axis=1,
                   keepdims=True) + p["bo"]


if __name__ == "__main__":
    B = 8
    key = jax.random.PRNGKey(0)
    k_img, k_txt, k_params = jax.random.split(key, 3)

    img_feats = jax.random.normal(k_img, (B, IMAGE_DIM), jnp.float32)
    text_feats = jax.random.normal(k_txt, (B, TEXT_DIM), jnp.float32)
    params = init_params(k_params)
    packed = pack_params(params)

    out = classifier_forward(img_feats, text_feats, packed)
    out = jax.block_until_ready(out)

    ref = reference_forward(img_feats, text_feats, params)
    assert out.shape == (B, OUT_DIM)
    assert jnp.allclose(out, ref, atol=1e-3, rtol=1e-3), "mismatch vs reference"

    # TODO(synk): 'concat'/'cross' fusion modes, the 22-class 'Propaganda' head,
    # and the return_embed=True path are not wired; this build fixes
    # fusion_mode='align', dataset='FB', eval-mode dropout/no batchnorm.
    print("KERNEL_OK")
</pallas_src>

<mosaic_0001>
module attributes {stable_mosaic.version = 11 : i64} {
  func.func @_classifier_kernel(%arg0: i32, %arg1: memref<8x256xf32, #tpu.memory_space<vmem>>, %arg2: memref<8x128xf32, #tpu.memory_space<vmem>>, %arg3: memref<640x128xbf16, #tpu.memory_space<vmem>>, %arg4: memref<8x128xf32, #tpu.memory_space<vmem>>, %arg5: memref<8x128xf32, #tpu.memory_space<vmem>>) attributes {dimension_semantics = [#tpu.dimension_semantics<parallel>], iteration_bounds = array<i64: 1>, scalar_prefetch = 0 : i64, scratch_operands = 0 : i64, tpu.core_type = #tpu.core_type<tc>, window_params = [{transform_indices = @transform_0, window_bounds = array<i64: 8, 256>}, {transform_indices = @transform_1, window_bounds = array<i64: 8, 128>}, {pipeline_mode = #tpu.pipeline_mode<synchronous>, transform_indices = @transform_2, window_bounds = array<i64: 640, 128>}, {pipeline_mode = #tpu.pipeline_mode<synchronous>, transform_indices = @transform_3, window_bounds = array<i64: 8, 128>}, {transform_indices = @transform_4, window_bounds = array<i64: 8, 128>}]} {
    %c0 = arith.constant 0 : index
    %c0_0 = arith.constant 0 : index
    %0 = vector.load %arg4[%c0, %c0_0] : memref<8x128xf32, #tpu.memory_space<vmem>>, vector<1x128xf32>
    %c1 = arith.constant 1 : index
    %c0_1 = arith.constant 0 : index
    %1 = vector.load %arg4[%c1, %c0_1] : memref<8x128xf32, #tpu.memory_space<vmem>>, vector<1x128xf32>
    %c2 = arith.constant 2 : index
    %c0_2 = arith.constant 0 : index
    %2 = vector.load %arg4[%c2, %c0_2] : memref<8x128xf32, #tpu.memory_space<vmem>>, vector<1x128xf32>
    %c3 = arith.constant 3 : index
    %c0_3 = arith.constant 0 : index
    %3 = vector.load %arg4[%c3, %c0_3] : memref<8x128xf32, #tpu.memory_space<vmem>>, vector<1x128xf32>
    %c4 = arith.constant 4 : index
    %c0_4 = arith.constant 0 : index
    %4 = vector.load %arg4[%c4, %c0_4] : memref<8x128xf32, #tpu.memory_space<vmem>>, vector<1x128xf32>
    %c5 = arith.constant 5 : index
    %c0_5 = arith.constant 0 : index
    %5 = vector.load %arg4[%c5, %c0_5] : memref<8x128xf32, #tpu.memory_space<vmem>>, vector<1x128xf32>
    %c0_6 = arith.constant 0 : index
    %c0_7 = arith.constant 0 : index
    %6 = vector.load %arg1[%c0_6, %c0_7] : memref<8x256xf32, #tpu.memory_space<vmem>>, vector<8x256xf32>
    %7 = arith.truncf %6 : vector<8x256xf32> to vector<8x256xbf16>
    %c0_8 = arith.constant 0 : index
    %c0_9 = arith.constant 0 : index
    %8 = vector.load %arg3[%c0_8, %c0_9] : memref<640x128xbf16, #tpu.memory_space<vmem>>, vector<256x128xbf16>
    %cst = arith.constant dense<0.000000e+00> : vector<8x128xf32>
    %9 = tpu.matmul %7, %8, %cst {dimension_numbers = #tpu.dot_dimension_numbers<[1], [0], [0], [1], [0, 0, 1, 1], [], []>} : vector<8x256xbf16>, vector<256x128xbf16>, vector<8x128xf32> -> vector<8x128xf32>
    %10 = vector.broadcast %0 : vector<1x128xf32> to vector<8x128xf32>
    %11 = arith.addf %9, %10 : vector<8x128xf32>
    %c0_10 = arith.constant 0 : index
    %c0_11 = arith.constant 0 : index
    %12 = vector.load %arg2[%c0_10, %c0_11] : memref<8x128xf32, #tpu.memory_space<vmem>>, vector<8x128xf32>
    %13 = arith.truncf %12 : vector<8x128xf32> to vector<8x128xbf16>
    %c256 = arith.constant 256 : index
    %c0_12 = arith.constant 0 : index
    %14 = vector.load %arg3[%c256, %c0_12] : memref<640x128xbf16, #tpu.memory_space<vmem>>, vector<128x128xbf16>
    %cst_13 = arith.constant dense<0.000000e+00> : vector<8x128xf32>
    %15 = tpu.matmul %13, %14, %cst_13 {dimension_numbers = #tpu.dot_dimension_numbers<[1], [0], [0], [1], [0, 0, 1, 1], [], []>} : vector<8x128xbf16>, vector<128x128xbf16>, vector<8x128xf32> -> vector<8x128xf32>
    %16 = vector.broadcast %1 : vector<1x128xf32> to vector<8x128xf32>
    %17 = arith.addf %15, %16 : vector<8x128xf32>
    %18 = arith.mulf %11, %11 : vector<8x128xf32>
    %cst_14 = arith.constant dense<0.000000e+00> : vector<8xf32>
    %19 = vector.multi_reduction <add>, %18, %cst_14 [1] : vector<8x128xf32> to vector<8xf32>
    %20 = vector.shape_cast %19 : vector<8xf32> to vector<8x1xf32>
    %cst_15 = arith.constant 1.000000e-24 : f32
    %21 = vector.broadcast %cst_15 : f32 to vector<8x1xf32>
    %22 = arith.maximumf %20, %21 : vector<8x1xf32>
    %23 = math.rsqrt %22 : vector<8x1xf32>
    %24 = arith.mulf %17, %17 : vector<8x128xf32>
    %cst_16 = arith.constant dense<0.000000e+00> : vector<8xf32>
    %25 = vector.multi_reduction <add>, %24, %cst_16 [1] : vector<8x128xf32> to vector<8xf32>
    %26 = vector.shape_cast %25 : vector<8xf32> to vector<8x1xf32>
    %cst_17 = arith.constant 1.000000e-24 : f32
    %27 = vector.broadcast %cst_17 : f32 to vector<8x1xf32>
    %28 = arith.maximumf %26, %27 : vector<8x1xf32>
    %29 = math.rsqrt %28 : vector<8x1xf32>
    %30 = vector.broadcast %23 : vector<8x1xf32> to vector<8x128xf32>
    %31 = arith.mulf %11, %30 : vector<8x128xf32>
    %32 = vector.broadcast %29 : vector<8x1xf32> to vector<8x128xf32>
    %33 = arith.mulf %17, %32 : vector<8x128xf32>
    %34 = arith.mulf %31, %33 : vector<8x128xf32>
    %35 = arith.truncf %34 : vector<8x128xf32> to vector<8x128xbf16>
    %c384 = arith.constant 384 : index
    %c0_18 = arith.constant 0 : index
    %36 = vector.load %arg3[%c384, %c0_18] : memref<640x128xbf16, #tpu.memory_space<vmem>>, vector<128x128xbf16>
    %cst_19 = arith.constant dense<0.000000e+00> : vector<8x128xf32>
    %37 = tpu.matmul %35, %36, %cst_19 {dimension_numbers = #tpu.dot_dimension_numbers<[1], [0], [0], [1], [0, 0, 1, 1], [], []>} : vector<8x128xbf16>, vector<128x128xbf16>, vector<8x128xf32> -> vector<8x128xf32>
    %38 = vector.broadcast %2 : vector<1x128xf32> to vector<8x128xf32>
    %39 = arith.addf %37, %38 : vector<8x128xf32>
    %cst_20 = arith.constant 0.000000e+00 : f32
    %40 = vector.broadcast %cst_20 : f32 to vector<8x128xf32>
    %41 = arith.maximumf %39, %40 : vector<8x128xf32>
    %42 = arith.truncf %41 : vector<8x128xf32> to vector<8x128xbf16>
    %c512 = arith.constant 512 : index
    %c0_21 = arith.constant 0 : index
    %43 = vector.load %arg3[%c512, %c0_21] : memref<640x128xbf16, #tpu.memory_space<vmem>>, vector<128x128xbf16>
    %cst_22 = arith.constant dense<0.000000e+00> : vector<8x128xf32>
    %44 = tpu.matmul %42, %43, %cst_22 {dimension_numbers = #tpu.dot_dimension_numbers<[1], [0], [0], [1], [0, 0, 1, 1], [], []>} : vector<8x128xbf16>, vector<128x128xbf16>, vector<8x128xf32> -> vector<8x128xf32>
    %45 = vector.broadcast %3 : vector<1x128xf32> to vector<8x128xf32>
    %46 = arith.addf %44, %45 : vector<8x128xf32>
    %cst_23 = arith.constant 0.000000e+00 : f32
    %47 = vector.broadcast %cst_23 : f32 to vector<8x128xf32>
    %48 = arith.maximumf %46, %47 : vector<8x128xf32>
    %49 = vector.broadcast %4 : vector<1x128xf32> to vector<8x128xf32>
    %50 = arith.mulf %48, %49 : vector<8x128xf32>
    %cst_24 = arith.constant dense<0.000000e+00> : vector<8xf32>
    %51 = vector.multi_reduction <add>, %50, %cst_24 [1] : vector<8x128xf32> to vector<8xf32>
    %52 = vector.shape_cast %51 : vector<8xf32> to vector<8x1xf32>
    %53 = vector.broadcast %52 : vector<8x1xf32> to vector<8x128xf32>
    %54 = vector.broadcast %5 : vector<1x128xf32> to vector<8x128xf32>
    %55 = arith.addf %53, %54 : vector<8x128xf32>
    %c0_25 = arith.constant 0 : index
    %c0_26 = arith.constant 0 : index
    %56 = vector.load %arg5[%c0_25, %c0_26] : memref<8x128xf32, #tpu.memory_space<vmem>>, vector<8x128xf32>
    tpu.vector_store %arg5[%c0_25, %c0_26], %55 {strides = array<i32>} : memref<8x128xf32, #tpu.memory_space<vmem>>, vector<8x128xf32>,
    return
  }
  func.func @transform_0(%arg0: i32) -> (i32, i32) {
    %c0_i32 = arith.constant 0 : i32
    %c0_i32_0 = arith.constant 0 : i32
    return %arg0, %c0_i32 : i32, i32
  }
  func.func @transform_1(%arg0: i32) -> (i32, i32) {
    %c0_i32 = arith.constant 0 : i32
    %c0_i32_0 = arith.constant 0 : i32
    return %arg0, %c0_i32 : i32, i32
  }
  func.func @transform_2(%arg0: i32) -> (i32, i32) {
    %c0_i32 = arith.constant 0 : i32
    %c0_i32_0 = arith.constant 0 : i32
    %c0_i32_1 = arith.constant 0 : i32
    return %c0_i32, %c0_i32_0 : i32, i32
  }
  func.func @transform_3(%arg0: i32) -> (i32, i32) {
    %c0_i32 = arith.constant 0 : i32
    %c0_i32_0 = arith.constant 0 : i32
    %c0_i32_1 = arith.constant 0 : i32
    return %c0_i32, %c0_i32_0 : i32, i32
  }
  func.func @transform_4(%arg0: i32) -> (i32, i32) {
    %c0_i32 = arith.constant 0 : i32
    %c0_i32_0 = arith.constant 0 : i32
    return %arg0, %c0_i32 : i32, i32
  }
}

</mosaic_0001>

<bundles_post_ra>
// kernel: tpu_custom_call.1
= control target key start
LH: loop header
LB: loop body
LE: loop exit
PB: predicated region body
PF: predicated region fallthrough
CT: control target
= control target key end

     0   :  { %9 = vsyncpa [#allocation3], 0  ;;  %s934_s0 = inlined_call_operand.hbm [shape: f32[8,256], index: 0, kind: input, shape index: {}]   ;;  %s935_s1 = inlined_call_operand.hbm [shape: f32[8,128], index: 1, kind: input, shape index: {}]   ;;  %s936_s2 = inlined_call_operand.hbm [shape: bf16[640,128], index: 2, kind: input, shape index: {}]   ;;  %s937_s3 = inlined_call_operand.hbm [shape: f32[8,128], index: 3, kind: input, shape index: {}]   ;;  %s938_s4 = inlined_call_operand.hbm [shape: f32[8,128], index: 4, kind: output, shape index: {}]  }
   0x1   :  { %10 = vsyncpa [#allocation6], 0 }
   0x2   :  { %11 = vsyncpa [#allocation9], 0  ;;  %s29_s17 = sshll.u32 %s935_s1, 4  ;;  %s30_s17 = int_to_ptr.hbm [resolvable:$true] %s29_s17 }
   0x3   :  { %12 = vsyncpa [#allocation4], 0  ;;  %s882_s18 = smov [#allocation5]   ;;  %s18_s22 = sshll.u32 %s934_s0, 4  ;;  %s19_s22 = int_to_ptr.hbm [resolvable:$true] %s18_s22 }
   0x4   :  { %s31_s19 = sshll.u32 %s882_s18, 4  ;;  %s883_s23 = smov [#allocation2]   ;;  %s32_s19 = int_to_ptr.vmem [resolvable:$true] %s31_s19 }
   0x5   :  { %34 = dma.hbm_to_vmem [thread:$0]  %s30_s17, 128, %s32_s19, [#allocation6]  }
   0x6   :  { %s20_s24 = sshll.u32 %s883_s23, 4  ;;  %s39_s27 = sshll.u32 %s936_s2, 4  ;;  %s21_s24 = int_to_ptr.vmem [resolvable:$true] %s20_s24  ;;  %s40_s27 = int_to_ptr.hbm [resolvable:$true] %s39_s27 }
   0x7   :  { %23 = dma.hbm_to_vmem [thread:$0]  %s19_s22, 256, %s21_s24, [#allocation3]  }
   0x8   :  { %s884_s1 = smov [#allocation7]   ;;  %s53_s5 = sshll.u32 %s937_s3, 4  ;;  %s54_s5 = int_to_ptr.hbm [resolvable:$true] %s53_s5 }
   0x9   :  { %s41_s28 = sshll.u32 %s884_s1, 4  ;;  %s885_s6 = smov 64   ;;  %s42_s28 = int_to_ptr.vmem [resolvable:$true] %s41_s28 }
   0xa   :  { %s886_s0 = smov 4   ;;  %s887_s7 = smov [#allocation8]  }
   0xb   :  { %47 = dma.hbm_to_vmem [thread:$0]  %s40_s27, 5120, %s42_s28, [#allocation6], %s885_s6, %s885_s6, %s886_s0  }
   0xc   :  { %s55_s8 = sshll.u32 %s887_s7, 4  ;;  %s56_s8 = int_to_ptr.vmem [resolvable:$true] %s55_s8 }
   0xd   :  { %58 = dma.hbm_to_vmem [thread:$0]  %s54_s5, 128, %s56_s8, [#allocation9]  }
   0xe   :  { %874 = dma.done.wait [#allocation3], 256  }
   0xf   :  { %875 = vsyncadd [#allocation3], 4294967040 }
  0x10   :  { %876 = dma.done.wait [#allocation6], 5248  }
  0x11   :  { %877 = vsyncadd [#allocation6], 4294962048 }
  0x12   :  { %878 = dma.done.wait [#allocation9], 128  }
  0x13   :  { %879 = vsyncadd [#allocation9], 4294967168  ;;  %v704_v0 = vld [vmem:[#allocation7 + $0x38] sm:$0xff]  ;;  %v703_v3 = vld [vmem:[#allocation7 + $0x30] sm:$0xff]  ;;  %s888_s2 = smov [#allocation10]   ;;  %s525_s11 = sshll.u32 %s938_s4, 4  ;;  %s526_s11 = int_to_ptr.hbm [resolvable:$true] %s525_s11 }
  0x14   :  { %v712_v1 = vld [vmem:[#allocation7 + $0x78] sm:$0xff]  ;;  %214 = vmatpush.bf16.msra.mxu0 %v704_v0  ;;  %v711_v4 = vld [vmem:[#allocation7 + $0x70] sm:$0xff]  ;;  %v702_v6 = vld [vmem:[#allocation7 + $0x28] sm:$0xff]  ;;  %s523_s3 = sshll.u32 %s888_s2, 4  ;;  %s524_s3 = int_to_ptr.vmem [resolvable:$true] %s523_s3 }
  0x15   :  { %v720_v2 = vld [vmem:[#allocation7 + $0xb8] sm:$0xff]  ;;  %227 = vmatpush.bf16.msra.mxu1 %v712_v1  ;;  %v719_v5 = vld [vmem:[#allocation7 + $0xb0] sm:$0xff]  ;;  %v710_v7 = vld [vmem:[#allocation7 + $0x68] sm:$0xff] }
  0x16   :  { %307 = vmatpush.bf16.msra.mxu2 %v720_v2  ;;  %v718_v8 = vld [vmem:[#allocation7 + $0xa8] sm:$0xff]  ;;  %v701_v9 = vld [vmem:[#allocation7 + $0x20] sm:$0xff]  ;;  %v700_v12 = vld [vmem:[#allocation7 + $0x18] sm:$0xff] }
  0x17   :  { %v709_v10 = vld [vmem:[#allocation7 + $0x60] sm:$0xff]  ;;  %v708_v13 = vld [vmem:[#allocation7 + $0x58] sm:$0xff]  ;;  %v699_v15 = vld [vmem:[#allocation7 + $0x10] sm:$0xff] }
  0x18   :  { %215 = vmatpush.bf16.msra.mxu0 %v703_v3  ;;  %v717_v11 = vld [vmem:[#allocation7 + $0xa0] sm:$0xff]  ;;  %v716_v14 = vld [vmem:[#allocation7 + $0x98] sm:$0xff]  ;;  %v707_v16 = vld [vmem:[#allocation7 + $0x50] sm:$0xff] }
  0x19   :  { %228 = vmatpush.bf16.msra.mxu1 %v711_v4  ;;  %v715_v17 = vld [vmem:[#allocation7 + $0x90] sm:$0xff]  ;;  %v698_v18 = vld [vmem:[#allocation7 + $0x8] sm:$0xff]  ;;  %v697_v21 = vld [vmem:[#allocation7] sm:$0xff] }
  0x1a   :  { %308 = vmatpush.bf16.msra.mxu2 %v719_v5  ;;  %v706_v19 = vld [vmem:[#allocation7 + $0x48] sm:$0xff]  ;;  %v705_v22 = vld [vmem:[#allocation7 + $0x40] sm:$0xff]  ;;  %v82_v24 = vld [vmem:[#allocation2 + $0x8] sm:$0xff] }
  0x1b   :  { %v714_v20 = vld [vmem:[#allocation7 + $0x88] sm:$0xff]  ;;  %v713_v25 = vld [vmem:[#allocation7 + $0x80] sm:$0xff]  ;;  %v240_v26 = vld [vmem:[#allocation5] sm:$0xff]  ;;  %v84_v28 = vpack.c.bf16 %v82_v24, %v82_v24 }
  0x1c   :  { %216 = vmatpush.bf16.msra.mxu0 %v702_v6  ;;  %v81_v23 = vld [vmem:[#allocation2] sm:$0xff]  ;;  %v241_v29 = vpack.c.bf16 %v240_v26, %v240_v26  ;;  %v744_v30 = vld [vmem:[#allocation8] ss:$0 sm:$0xff]  ;;  %v745_v35 = vld [vmem:[#allocation8 + $0x1] ss:$0 sm:$0xff] }
  0x1d   :  { %229 = vmatpush.bf16.msra.mxu1 %v710_v7  ;;  %v83_v27 = vpack.c.bf16 %v81_v23, %v81_v23  ;;  %v728_v43 = vld [vmem:[#allocation7 + $0xf8] sm:$0xff]  ;;  %v727_v44 = vld [vmem:[#allocation7 + $0xf0] sm:$0xff]  ;;  %v726_v45 = vld [vmem:[#allocation7 + $0xe8] sm:$0xff] }
  0x1e   :  { %309 = vmatpush.bf16.msra.mxu2 %v718_v8  ;;  %417 = vmatpush.bf16.msra.mxu3 %v728_v43  ;;  %v725_v46 = vld [vmem:[#allocation7 + $0xe0] sm:$0xff]  ;;  %v724_v47 = vld [vmem:[#allocation7 + $0xd8] sm:$0xff]  ;;  %v723_v48 = vld [vmem:[#allocation7 + $0xd0] sm:$0xff] }
  0x1f   :  { %v722_v49 = vld [vmem:[#allocation7 + $0xc8] sm:$0xff]  ;;  %v721_v50 = vld [vmem:[#allocation7 + $0xc0] sm:$0xff]  ;;  %v736_v53 = vld [vmem:[#allocation7 + $0x138] sm:$0xff] }
  0x20   :  { %217 = vmatpush.bf16.msra.mxu0 %v701_v9  ;;  %v735_v54 = vld [vmem:[#allocation7 + $0x130] sm:$0xff]  ;;  %v734_v58 = vld [vmem:[#allocation7 + $0x128] sm:$0xff]  ;;  %v733_v61 = vld [vmem:[#allocation7 + $0x120] sm:$0xff] }
  0x21   :  { %230 = vmatpush.bf16.msra.mxu1 %v709_v10  ;;  %v732_v0 = vld [vmem:[#allocation7 + $0x118] sm:$0xff]  ;;  %v731_v4 = vld [vmem:[#allocation7 + $0x110] sm:$0xff]  ;;  %v747_v23 = vld [vmem:[#allocation8 + $0x3] ss:$0 sm:$0xff] }
  0x22   :  { %310 = vmatpush.bf16.msra.mxu2 %v717_v11  ;;  %418 = vmatpush.bf16.msra.mxu3 %v727_v44  ;;  %v748_v26 = vld [vmem:[#allocation8 + $0x4] ss:$0 sm:$0xff] }
  0x24   :  { %218 = vmatpush.bf16.msra.mxu0 %v700_v12 }
  0x25   :  { %231 = vmatpush.bf16.msra.mxu1 %v708_v13 }
  0x26   :  { %311 = vmatpush.bf16.msra.mxu2 %v716_v14  ;;  %419 = vmatpush.bf16.msra.mxu3 %v726_v45 }
  0x28   :  { %219 = vmatpush.bf16.msra.mxu0 %v699_v15  ;;  %v730_v15 = vld [vmem:[#allocation7 + $0x108] sm:$0xff] }
  0x29   :  { %232 = vmatpush.bf16.msra.mxu1 %v707_v16  ;;  %v729_v16 = vld [vmem:[#allocation7 + $0x100] sm:$0xff] }
  0x2a   :  { %312 = vmatpush.bf16.msra.mxu2 %v715_v17  ;;  %420 = vmatpush.bf16.msra.mxu3 %v725_v46  ;;  %v746_v17 = vld [vmem:[#allocation8 + $0x2] ss:$0 sm:$0xff] }
  0x2c   :  { %220 = vmatpush.bf16.msra.mxu0 %v698_v18 }
  0x2d   :  { %233 = vmatpush.bf16.msra.mxu1 %v706_v19 }
  0x2e   :  { %313 = vmatpush.bf16.msra.mxu2 %v714_v20  ;;  %421 = vmatpush.bf16.msra.mxu3 %v724_v47 }
  0x30   :  { %221 = vmatpush.bf16.msra.mxu0 %v697_v21 }
  0x31   :  { %234 = vmatpush.bf16.msra.mxu1 %v705_v22 }
  0x32   :  { %314 = vmatpush.bf16.msra.mxu2 %v713_v25  ;;  %422 = vmatpush.bf16.msra.mxu3 %v723_v48 }
  0x33   :  { %222 = vmatmul.bf16.vlgmr.msra.gmra.mxu0 %v83_v27 }
  0x34   :  { %235 = vmatmul.bf16.vlgmr.msra.gmra.mxu1 %v84_v28  ;;  %497 = vmatpush.bf16.msrb.mxu0 %v736_v53 }
  0x35   :  { %315 = vmatmul.bf16.vlgmr.msra.gmra.mxu2 %v241_v29 }
  0x36   :  { %423 = vmatpush.bf16.msra.mxu3 %v722_v49 }
  0x38   :  { %498 = vmatpush.bf16.msrb.mxu0 %v735_v54 }
  0x3a   :  { %424 = vmatpush.bf16.msra.mxu3 %v721_v50 }
  0x3c   :  { %499 = vmatpush.bf16.msrb.mxu0 %v734_v58 }
  0x40   :  { %500 = vmatpush.bf16.msrb.mxu0 %v733_v61 }
  0x44   :  { %501 = vmatpush.bf16.msrb.mxu0 %v732_v0 }
  0x48   :  { %502 = vmatpush.bf16.msrb.mxu0 %v731_v4 }
  0x4c   :  { %503 = vmatpush.bf16.msrb.mxu0 %v730_v15 }
  0x50   :  { %504 = vmatpush.bf16.msrb.mxu0 %v729_v16 }
  0xb0   :  { %v223_v31 = vpop.f32.mrf.mxu0 }
  0xb1   :  { %v236_v32 = vpop.f32.mrf.mxu1  ;;  %v224_v33 = vadd.f32 %v744_v30, %v223_v31  ;;  %v749_v30 = vld [vmem:[#allocation8 + $0x5] ss:$0 sm:$0xff] }
  0xb3   :  { %v926_v34 = vadd.f32 %v236_v32, %v224_v33 }
  0xb5   :  { %v320_v36 = vmul.f32 %v926_v34, %v926_v34 }
  0xb7   :  { %321 = vadd.xlane.f32.xlu0 %v320_v36 }
  0xb8   :  { %v316_v37 = vpop.f32.mrf.mxu2  ;;  %v225_v39 = vpop.f32.mrf.mxu0 }
  0xb9   :  { %v317_v38 = vadd.f32 %v745_v35, %v316_v37  ;;  %v238_v40 = vpop.f32.mrf.mxu1 }
  0xbb   :  { %v334_v41 = vmul.f32 %v317_v38, %v317_v38 }
  0xbf   :  { %335 = vadd.xlane.f32.xlu0 %v334_v41 }
  0xc0   :  { %v318_v42 = vpop.f32.mrf.mxu2 }
 0x12a   :  { %v322_v51 = vpop.xlane.xlu0 %321 }
 0x12b   :  { %v323_v52 = vmax.f32 %v322_v51, 1e-24 }
 0x12d   :  { %750 = vrsqrt.f32 %v323_v52  ;;  %vm330_vm1 = vweird.f32 %v323_v52 }
 0x132   :  { %v336_v55 = vpop.xlane.xlu0 %335 }
 0x133   :  { %v751_v56 = vpop.eup %750  ;;  %v337_v57 = vmax.f32 %v336_v55, 1e-24 }
 0x134   :  { %v325_v59 = vmul.f32 %v751_v56, %v323_v52  ;;  %vm331_vm0 = vweird.f32 %v751_v56 }
 0x135   :  { %752 = vrsqrt.f32 %v337_v57  ;;  %vm332_vm3 = vmor %vm330_vm1, %vm331_vm0  ;;  %vm344_vm4 = vweird.f32 %v337_v57 }
 0x136   :  { %v326_v60 = vmul.f32 %v751_v56, %v325_v59 }
 0x138   :  { %v327_v62 = vmul.f32 0.5, %v326_v60 }
 0x13a   :  { %v328_v1 = vsub.f32 1.5, %v327_v62 }
 0x13b   :  { %v753_v63 = vpop.eup %752 }
 0x13c   :  { %v339_v2 = vmul.f32 %v753_v63, %v337_v57  ;;  %v329_v6 = vmul.f32 %v751_v56, %v328_v1  ;;  %vm345_vm2 = vweird.f32 %v753_v63 }
 0x13d   :  { %vm346_vm5 = vmor %vm344_vm4, %vm345_vm2 }
 0x13e   :  { %v340_v3 = vmul.f32 %v753_v63, %v339_v2  ;;  %v333_v9 = vsel %vm332_vm3, %v751_v56, %v329_v6 }
 0x13f   :  { %v348_v11 = vmul.f32 %v333_v9, %v926_v34 }
 0x140   :  { %v341_v5 = vmul.f32 0.5, %v340_v3 }
 0x142   :  { %v342_v7 = vsub.f32 1.5, %v341_v5 }
 0x144   :  { %v343_v8 = vmul.f32 %v753_v63, %v342_v7 }
 0x146   :  { %v347_v10 = vsel %vm346_vm5, %v753_v63, %v343_v8 }
 0x147   :  { %v349_v12 = vmul.f32 %v347_v10, %v317_v38 }
 0x149   :  { %v350_v13 = vmul.f32 %v349_v12, %v348_v11 }
 0x14b   :  { %v351_v14 = vpack.c.bf16 %v350_v13, %v350_v13 }
 0x14d   :  { %425 = vmatmul.bf16.vlgmr.msra.gmra.mxu3 %v351_v14 }
 0x1d0   :  { %v426_v18 = vpop.f32.mrf.mxu3 }
 0x1d1   :  { %v427_v19 = vadd.f32 %v746_v17, %v426_v18 }
 0x1d3   :  { %v430_v20 = vmax.f32 %v427_v19, 0.0 }
 0x1d5   :  { %v431_v21 = vpack.c.bf16 %v430_v20, %v430_v20 }
 0x1d7   :  { %505 = vmatmul.bf16.vlgmr.msrb.gmra.mxu0 %v431_v21 }
 0x1d8   :  { %v428_v22 = vpop.f32.mrf.mxu3 }
 0x254   :  { %v506_v24 = vpop.f32.mrf.mxu0 }
 0x255   :  { %v507_v25 = vadd.f32 %v747_v23, %v506_v24 }
 0x257   :  { %v510_v27 = vmax.f32 %v507_v25, 0.0 }
 0x259   :  { %v512_v28 = vmul.f32 %v748_v26, %v510_v27 }
 0x25b   :  { %513 = vadd.xlane.f32.xlu1 %v512_v28 }
 0x25c   :  { %v508_v29 = vpop.f32.mrf.mxu0 }
 0x2ce   :  { %v514_v31 = vpop.xlane.xlu1 %513 }
 0x2cf   :  { %v516_v32 = vadd.f32 %v749_v30, %v514_v31 }
 0x2d1   :  { %517 = vst [vmem:[#allocation10] sm:$0xff] %v516_v32 }
 0x2d2   :  { %528 = dma.vmem_to_hbm [thread:$0]  %s524_s3, 128, %s526_s11, [#allocation4]  }
 0x2d3   :  { %880 = dma.done.wait [#allocation4], 128  }
 0x2d4   :  { %881 = vsyncadd [#allocation4], 4294967168 }
 0x2d5   :  { %533 = vsyncpa [#allocation3], 1 }
 0x2d6   :  { %534 = vsyncpa [#allocation6], 1 }
 0x2d7   :  { %535 = vsyncpa [#allocation9], 1 }
 0x2d8   :  { %536 = vsyncpa [#allocation4], 1 }

</bundles_post_ra>
